<compile_context>
chip_gen: v7x
topology: tpu7x:2x2x1
jax: 0.10.0
libtpu: 0.0.40
codegen_flags: <defaults>
</compile_context>

<pallas_src>
import math

import jax
import jax.numpy as jnp
from jax.experimental import pallas as pl
from jax.experimental.pallas import tpu as pltpu


_LANE = 128     # lane width  (last-dim tiling unit)
_SUBLANE = 8    # sublane width (second-to-last-dim tiling unit, f32)


def _round_up(n, m):
    return ((n + m - 1) // m) * m


def _pick_tile(total, max_tile, unit):
    """Largest multiple of `unit` that divides `total` and is <= max_tile.

    `total` is assumed to be a multiple of `unit` (guaranteed by the padded
    parameter prep), so this always terminates at >= unit.
    """
    t = min(max_tile, total)
    t = (t // unit) * unit
    while total % t:
        t -= unit
    return t


def _dec_init_kernel(x_ref, wt_ref, b_ref, o_ref):
    # x_ref : [TB, INp]   f32  (VMEM)
    # wt_ref: [INp, TN]   bf16 (VMEM)  W pre-transposed, lane/sublane padded
    # b_ref : [1, TN]     f32  (VMEM)
    # o_ref : [TB, TN]    f32  (VMEM)  lane-dense output
    x = x_ref[...].astype(wt_ref.dtype)                 # VPU pack -> bf16
    y = jnp.dot(x, wt_ref[...],
                preferred_element_type=jnp.float32)     # MXU, f32 accumulate
    y = y + b_ref[...]                                  # VPU broadcast over batch
    o_ref[...] = jnp.tanh(y).astype(o_ref.dtype)        # EUP tanh (own slot)


def prepare_dec_init_params(weight, bias, param_dtype=jnp.bfloat16):
    """One-time (init-time) parameter prep: transpose + pad + downcast.

    weight: [OUT, IN] float32 (PyTorch nn.Linear layout)
    bias  : [OUT]     float32
    returns (wt_padded [IN_pad, OUT_pad] bf16, bias_padded [1, OUT_pad] f32, OUT)
    """
    out_f, in_f = weight.shape
    in_p = _round_up(in_f, _SUBLANE)     # sublane-align the contraction dim
    out_p = _round_up(out_f, _LANE)      # lane-align the output dim
    wt_padded = (
        jnp.zeros((in_p, out_p), param_dtype)
        .at[:in_f, :out_f].set(weight.T.astype(param_dtype))
    )
    bias_padded = (
        jnp.zeros((1, out_p), jnp.float32)
        .at[0, :out_f].set(bias.astype(jnp.float32))
    )
    return wt_padded, bias_padded, out_f


def dec_init_forward(last_enc_h, wt_padded, bias_padded, out_features,
                     *, tile_b=512, tile_n=2048):
    """tanh(last_enc_h @ W^T + b) using pre-prepared (transposed, padded) params.

    last_enc_h : [B, IN] float32
    wt_padded  : [IN_pad, OUT_pad] bf16  (from prepare_dec_init_params)
    bias_padded: [1, OUT_pad]      f32
    returns    : [B, out_features] float32
    """
    B, IN = last_enc_h.shape
    INp, OUTp = wt_padded.shape

    x = last_enc_h
    if IN != INp:
        # Rare (in_features not a multiple of 8): single pad of the K dim so
        # it matches the sublane-aligned weight.  Zero columns are harmless.
        x = jnp.pad(x, ((0, 0), (0, INp - IN)))

    xb = x.dtype.itemsize
    wb = wt_padded.dtype.itemsize

    if B <= tile_b and OUTp <= tile_n:
        # ---- Whole-array single-block call (typical decode-init sizes). ----
        # No batch pad: whole-array blocks are exempt from the (8,128) rule;
        # the masked sublane store on <8 rows beats an extra XLA pad op.
        buf_bytes = B * INp * xb + INp * OUTp * wb + OUTp * 4 + B * OUTp * 4
        vmem_limit = int(min(64 * 2**20, 2 * buf_bytes + (2 << 20)))
        cost = pl.CostEstimate(
            flops=2 * B * INp * OUTp,
            transcendentals=B * OUTp,
            bytes_accessed=buf_bytes,
        )
        out = pl.pallas_call(
            _dec_init_kernel,
            out_shape=jax.ShapeDtypeStruct((B, OUTp), jnp.float32),
            in_specs=[
                pl.BlockSpec(memory_space=pltpu.MemorySpace.VMEM),
                pl.BlockSpec(memory_space=pltpu.MemorySpace.VMEM),
                pl.BlockSpec(memory_space=pltpu.MemorySpace.VMEM),
            ],
            out_specs=pl.BlockSpec(memory_space=pltpu.MemorySpace.VMEM),
            compiler_params=pltpu.CompilerParams(vmem_limit_bytes=vmem_limit),
            cost_estimate=cost,
        )(x, wt_padded, bias_padded)
        return out[:, :out_features]

    # ---- Tiled path: large batch and/or large output width. ----
    TN = _pick_tile(OUTp, tile_n, _LANE)
    TB = min(tile_b, _round_up(B, _SUBLANE))
    Bp = _round_up(B, TB)
    if Bp != B:
        x = jnp.pad(x, ((0, Bp - B), (0, 0)))   # single pad op
    grid = (Bp // TB, OUTp // TN)

    block_bytes = TB * INp * xb + INp * TN * wb + TN * 4 + TB * TN * 4
    vmem_limit = int(min(64 * 2**20, 2 * block_bytes + (2 << 20)))
    cost = pl.CostEstimate(
        flops=2 * Bp * INp * OUTp,
        transcendentals=Bp * OUTp,
        bytes_accessed=(Bp * INp * xb
                        + grid[0] * INp * OUTp * wb   # weight re-fetched per batch tile
                        + OUTp * 4
                        + Bp * OUTp * 4),
    )
    out = pl.pallas_call(
        _dec_init_kernel,
        out_shape=jax.ShapeDtypeStruct((Bp, OUTp), jnp.float32),
        grid=grid,
        in_specs=[
            pl.BlockSpec((TB, INp), lambda i, j: (i, 0)),
            pl.BlockSpec((INp, TN), lambda i, j: (0, j)),
            pl.BlockSpec((1, TN), lambda i, j: (0, j)),
        ],
        out_specs=pl.BlockSpec((TB, TN), lambda i, j: (i, j)),
        compiler_params=pltpu.CompilerParams(
            dimension_semantics=("parallel", "parallel"),
            vmem_limit_bytes=vmem_limit,
        ),
        cost_estimate=cost,
    )(x, wt_padded, bias_padded)
    return out[:B, :out_features]


if __name__ == "__main__":
    # Small shapes consistent with the module:
    #   brnn=True -> num_directions=2, enc_rnn_size=64 -> in_features=32
    #   dec_rnn_size=32, batch=2
    batch = 2
    enc_rnn_size = 64
    num_directions = 2
    in_features = enc_rnn_size // num_directions   # 32
    dec_rnn_size = 32

    key = jax.random.PRNGKey(0)
    k_x, k_w, k_b, k_x2 = jax.random.split(key, 4)

    # Deterministic parameter init mimicking nn.Linear's default
    # uniform(-1/sqrt(in_features), 1/sqrt(in_features)).
    bound = 1.0 / math.sqrt(in_features)
    weight = jax.random.uniform(
        k_w, (dec_rnn_size, in_features), jnp.float32, minval=-bound, maxval=bound
    )
    bias = jax.random.uniform(
        k_b, (dec_rnn_size,), jnp.float32, minval=-bound, maxval=bound
    )
    last_enc_h = jax.random.normal(k_x, (batch, in_features), jnp.float32)

    # Init-time parameter prep (transpose + pad + bf16 downcast, done once).
    wt_p, b_p, out_f = prepare_dec_init_params(weight, bias)

    # --- Whole-array path (typical decode-init call) ---
    out = dec_init_forward(last_enc_h, wt_p, b_p, out_f)
    out = jax.block_until_ready(out)

    ref = jnp.tanh(last_enc_h @ weight.T + bias)
    assert out.shape == (batch, dec_rnn_size)
    # bf16 weights => loosen the tolerance vs. the f32 reference.
    assert jnp.allclose(out, ref, atol=2e-2, rtol=2e-2)

    # --- Exercise the tiled path with tiny tiles (batch=16, TB=8) ---
    x_big = jax.random.normal(k_x2, (16, in_features), jnp.float32)
    out_t = dec_init_forward(x_big, wt_p, b_p, out_f, tile_b=8, tile_n=128)
    out_t = jax.block_until_ready(out_t)
    ref_t = jnp.tanh(x_big @ weight.T + bias)
    assert out_t.shape == (16, dec_rnn_size)
    assert jnp.allclose(out_t, ref_t, atol=2e-2, rtol=2e-2)

    print("KERNEL_OK")
</pallas_src>

<mosaic_0001>
module attributes {stable_mosaic.version = 11 : i64} {
  func.func @_dec_init_kernel(%arg0: memref<2x32xf32, #tpu.memory_space<vmem>>, %arg1: memref<32x128xbf16, #tpu.memory_space<vmem>>, %arg2: memref<1x128xf32, #tpu.memory_space<vmem>>, %arg3: memref<2x128xf32, #tpu.memory_space<vmem>>) attributes {dimension_semantics = [], scalar_prefetch = 0 : i64, scratch_operands = 0 : i64, tpu.core_type = #tpu.core_type<tc>} {
    %c0 = arith.constant 0 : index
    %c0_0 = arith.constant 0 : index
    %0 = vector.load %arg0[%c0, %c0_0] : memref<2x32xf32, #tpu.memory_space<vmem>>, vector<2x32xf32>
    %1 = arith.truncf %0 : vector<2x32xf32> to vector<2x32xbf16>
    %c0_1 = arith.constant 0 : index
    %c0_2 = arith.constant 0 : index
    %2 = vector.load %arg1[%c0_1, %c0_2] : memref<32x128xbf16, #tpu.memory_space<vmem>>, vector<32x128xbf16>
    %cst = arith.constant dense<0.000000e+00> : vector<2x128xf32>
    %3 = tpu.matmul %1, %2, %cst {dimension_numbers = #tpu.dot_dimension_numbers<[1], [0], [0], [1], [0, 0, 1, 1], [], []>} : vector<2x32xbf16>, vector<32x128xbf16>, vector<2x128xf32> -> vector<2x128xf32>
    %c0_3 = arith.constant 0 : index
    %c0_4 = arith.constant 0 : index
    %4 = vector.load %arg2[%c0_3, %c0_4] : memref<1x128xf32, #tpu.memory_space<vmem>>, vector<1x128xf32>
    %5 = vector.broadcast %4 : vector<1x128xf32> to vector<2x128xf32>
    %6 = arith.addf %3, %5 : vector<2x128xf32>
    %7 = math.tanh %6 : vector<2x128xf32>
    %c0_5 = arith.constant 0 : index
    %c0_6 = arith.constant 0 : index
    %8 = vector.load %arg3[%c0_5, %c0_6] : memref<2x128xf32, #tpu.memory_space<vmem>>, vector<2x128xf32>
    tpu.vector_store %arg3[%c0_5, %c0_6], %7 {strides = array<i32>} : memref<2x128xf32, #tpu.memory_space<vmem>>, vector<2x128xf32>,
    return
  }
}

</mosaic_0001>

<bundles_post_ra>
// kernel: tpu_custom_call.1
= control target key start
LH: loop header
LB: loop body
LE: loop exit
PB: predicated region body
PF: predicated region fallthrough
CT: control target
= control target key end

     0   :  { %8 = vsyncpa [#allocation3], 0  ;;  %s300_s0 = inlined_call_operand.hbm [shape: f32[2,32], index: 0, kind: input, shape index: {}]   ;;  %s301_s1 = inlined_call_operand.hbm [shape: bf16[32,128], index: 1, kind: input, shape index: {}]   ;;  %s302_s2 = inlined_call_operand.vmem [shape: f32[1,128], index: 2, kind: input, shape index: {}]   ;;  %s303_s3 = inlined_call_operand.hbm [shape: f32[2,128], index: 3, kind: output, shape index: {}]  }
   0x1   :  { %9 = vsyncpa [#allocation6], 0 }
   0x2   :  { %10 = vsyncpa [#allocation4], 0  ;;  %s227_s12 = smov [#allocation2]   ;;  %s228_s14 = smov [#allocation5]  }
   0x3   :  { %s17_s13 = sshll.u32 %s227_s12, 4  ;;  %s26_s15 = sshll.u32 %s228_s14, 4  ;;  %s18_s13 = int_to_ptr.vmem [resolvable:$true] %s17_s13  ;;  %s254_s15 = int_to_ptr.vmem [resolvable:$true] %s26_s15 }
   0x4   :  { %s155_s18 = scalar_lea.hbm %s300_s0, 32 }
   0x5   :  { %p156_p0 = scmp.ne.s32.totalorder %s300_s0, %s155_s18  ;;  %p159_p1 = scmp.lt.u32.totalorder %s155_s18, %s300_s0 }
   0x7   :  { %p161_p2 = pnand %p159_p1, %p156_p0 }
   0x9   :  { %164 = shalt.err (!%p161_p2)
}
   0xa   :  { %s165_s23 = scalar_lea.vmem %s18_s13, 32  ;;  %p170_p4 = scmp.lt.s32.totalorder %s18_s13, %s18_s13 }
   0xb   :  { %p166_p3 = scmp.ne.s32.totalorder %s18_s13, %s165_s23  ;;  %p171_p5 = scmp.lt.s32.totalorder %s165_s23, %s165_s23 }
   0xd   :  { %p172_p6 = por %p171_p5, %p170_p4 }
   0xf   :  { %p173_p7 = pnand %p172_p6, %p166_p3 }
  0x11   :  { %176 = shalt.err (!%p173_p7)
}
  0x12   :  { %20 = dma.hbm_to_vmem [thread:$0]  %s300_s0, 32, %s18_s13, [#allocation3]  }
  0x13   :  { %s177_s28 = scalar_lea.hbm %s301_s1, 256 }
  0x14   :  { %p178_p8 = scmp.ne.s32.totalorder %s301_s1, %s177_s28  ;;  %p181_p9 = scmp.lt.u32.totalorder %s177_s28, %s301_s1 }
  0x16   :  { %p183_p10 = pnand %p181_p9, %p178_p8 }
  0x18   :  { %186 = shalt.err (!%p183_p10)
}
  0x19   :  { %s187_s6 = scalar_lea.vmem %s254_s15, 256  ;;  %p192_p12 = scmp.lt.s32.totalorder %s254_s15, %s254_s15 }
  0x1a   :  { %p188_p11 = scmp.ne.s32.totalorder %s254_s15, %s187_s6  ;;  %p193_p13 = scmp.lt.s32.totalorder %s187_s6, %s187_s6 }
  0x1c   :  { %p194_p0 = por %p193_p13, %p192_p12 }
  0x1e   :  { %p195_p1 = pnand %p194_p0, %p188_p11 }
  0x20   :  { %198 = shalt.err (!%p195_p1)
}
  0x21   :  { %s229_s0 = smov 64   ;;  %s230_s7 = smov 4  }
  0x22   :  { %32 = dma.hbm_to_vmem [thread:$0]  %s301_s1, 256, %s254_s15, [#allocation6], %s229_s0, %s229_s0, %s230_s7  }
  0x23   :  { %221 = dma.done.wait [#allocation3], 32  }
  0x24   :  { %222 = vsyncadd [#allocation3], 4294967264 }
  0x25   :  { %223 = dma.done.wait [#allocation6], 256  }
  0x26   :  { %224 = vsyncadd [#allocation6], 4294967040  ;;  %v231_v0 = vmov 0.0   ;;  %vm232_vm0 = vmmov 0   ;;  %v151_v1 = vld [vmem:[#allocation5] sm:$0xff]   ;;  %v152_v2 = vld [vmem:[#allocation5 + $0x8] sm:$0xff]  }
  0x27   :  { %136 = vmatprep.subr.bf16.mxu0 %v231_v0  ;;  %140 = vmatprep.mubr.msk.bf16.mxu0 %vm232_vm0, %v231_v0  ;;  %v42_v3 = vld [vmem:[#allocation2] sm:$0x3]  ;;  %vm67_vm1 = vcmask 261120   ;;  %s233_s1 = smov [#allocation7]  }
  0x28   :  { %137 = vmatpush3.bf16.msra.mxu0 %v151_v1  ;;  %v43_v4 = vpack.c.bf16 %v42_v3, %v42_v3  ;;  %v129_v5 = vld [vmem:[%s302_s2] ss:$0 sm:$0xff]  ;;  %s119_s12 = sshll.u32 %s233_s1, 4  ;;  %s120_s12 = int_to_ptr.vmem [resolvable:$true] %s119_s12 }
  0x29   :  { %138 = vmatprep.subr.bf16.mxu0 %v231_v0  ;;  %s199_s13 = scalar_lea.vmem %s120_s12, 32  ;;  %p204_p3 = scmp.lt.s32.totalorder %s120_s12, %s120_s12 }
  0x2a   :  { %p200_p2 = scmp.ne.s32.totalorder %s120_s12, %s199_s13  ;;  %p205_p4 = scmp.lt.s32.totalorder %s199_s13, %s199_s13 }
  0x2c   :  { %139 = vmatpush3.bf16.msra.mxu0 %v152_v2  ;;  %p206_p5 = por %p205_p4, %p204_p3 }
  0x2e   :  { %p207_p6 = pnand %p206_p5, %p200_p2 }
  0x2f   :  { %141 = vmatmul.mubr.msk.bf16.vlgmr.msra.gmra.mrb[0].mxu0 %vm67_vm1, %v43_v4 }
 0x102   :  { %v105_v6 = vpop.f32.mrb[0].mxu0 }
 0x103   :  { %v106_v7 = vadd.f32 %v129_v5, %v105_v6  ;;  %v142_v8 = vpop.f32.mrb[1].mxu0 }
 0x104   :  { %v108_v9 = vpop.f32.mrb[2].mxu0 }
 0x105   :  { %153 = vtanh.f32 %v106_v7  ;;  %v143_v10 = vpop.f32.mrb[3].mxu0 }
 0x10f   :  { %v154_v11 = vpop.eup %153 }
 0x110   :  { %112 = vst [vmem:[#allocation7] sm:$0x3] %v154_v11 }
 0x111   :  { %210 = shalt.err (!%p207_p6)
}
 0x112   :  { %s211_s15 = scalar_lea.hbm %s303_s3, 32 }
 0x113   :  { %p212_p7 = scmp.ne.s32.totalorder %s303_s3, %s211_s15  ;;  %p215_p8 = scmp.lt.u32.totalorder %s211_s15, %s303_s3 }
 0x115   :  { %p217_p9 = pnand %p215_p8, %p212_p7 }
 0x117   :  { %220 = shalt.err (!%p217_p9)
}
 0x118   :  { %122 = dma.vmem_to_hbm [thread:$0]  %s120_s12, 32, %s303_s3, [#allocation4]  }
 0x119   :  { %225 = dma.done.wait [#allocation4], 32  }
 0x11a   :  { %226 = vsyncadd [#allocation4], 4294967264 }
 0x11b   :  { %126 = vsyncpa [#allocation3], 1 }
 0x11c   :  { %127 = vsyncpa [#allocation6], 1 }
 0x11d   :  { %128 = vsyncpa [#allocation4], 1 }

</bundles_post_ra>
